<compile_context>
chip_gen: v5e
topology: v5e:2x2
jax: 0.10.0
libtpu: 0.0.40
codegen_flags: <defaults>
</compile_context>

<pallas_src>
import functools

import jax
import jax.numpy as jnp
from jax.experimental import pallas as pl
from jax.experimental.pallas import tpu as pltpu

LANE = 128
SUBLANE = 8


def _round_up(n, m):
    return (n + m - 1) // m * m


def _cdiv(a, b):
    return (a + b - 1) // b


def mlp_kernel(x_ref, w1_ref, b1_ref, w2_ref, b2_ref, w3_ref, b3_ref, o_ref):
    x = x_ref[...]  # (TB, in_f) f32

    h1 = jnp.dot(x, w1_ref[...], preferred_element_type=jnp.float32) + b1_ref[...]
    h1 = jnp.maximum(h1, 0.0)

    h2 = jnp.dot(h1, w2_ref[...], preferred_element_type=jnp.float32) + b2_ref[...]
    h2 = jnp.maximum(h2, 0.0)

    y = jnp.dot(h2, w3_ref[...], preferred_element_type=jnp.float32) + b3_ref[...]
    o_ref[...] = y.astype(o_ref.dtype)  # (TB, out_f), out_f real columns only


@functools.partial(jax.jit, static_argnames=("block_batch",))
def mlp_forward(x, params, *, block_batch=1024):
    """x: (B, in_features) f32; params: w1,b1,w2,b2,w3,b3 (weights as (in,out))."""
    w1, b1 = params["w1"], params["b1"]
    w2, b2 = params["w2"], params["b2"]
    w3, b3 = params["w3"], params["b3"]

    B, in_f = x.shape
    h1_f, h2_f, out_f = w1.shape[1], w2.shape[1], w3.shape[1]

    # Pad only the VMEM-resident hidden dims to lane width.  The streamed
    # activation (in_f) and output (out_f) keep their real widths.
    H1p = _round_up(h1_f, LANE)
    H2p = _round_up(h2_f, LANE)

    # Batch: pad only to the sublane multiple; pick a large tile, but keep the
    # grid >= 2 steps when possible so both v7x TensorCores get work.
    Bp = _round_up(B, SUBLANE)
    half = _round_up(_cdiv(Bp, 2), SUBLANE)
    TB = max(SUBLANE, min(block_batch, half))
    grid = (_cdiv(Bp, TB),)  # partial last block handled by Pallas

    f32 = jnp.float32
    x_p = x.astype(f32)
    if Bp != B:
        x_p = jnp.pad(x_p, ((0, Bp - B), (0, 0)))

    def pad2d(a, rows, cols):
        a = a.astype(f32)
        return jnp.pad(a, ((0, rows - a.shape[0]), (0, cols - a.shape[1])))

    w1_p = pad2d(w1, in_f, H1p)
    b1_p = pad2d(b1.reshape(1, -1), 1, H1p)
    w2_p = pad2d(w2, H1p, H2p)
    b2_p = pad2d(b2.reshape(1, -1), 1, H2p)
    w3_p = pad2d(w3, H2p, out_f)
    b3_p = pad2d(b3.reshape(1, -1), 1, out_f)

    in_specs = [
        pl.BlockSpec((TB, in_f), lambda i: (i, 0)),     # streamed activations
        pl.BlockSpec((in_f, H1p), lambda i: (0, 0)),    # weights: VMEM-resident
        pl.BlockSpec((1, H1p), lambda i: (0, 0)),
        pl.BlockSpec((H1p, H2p), lambda i: (0, 0)),
        pl.BlockSpec((1, H2p), lambda i: (0, 0)),
        pl.BlockSpec((H2p, out_f), lambda i: (0, 0)),
        pl.BlockSpec((1, out_f), lambda i: (0, 0)),
    ]
    out_specs = pl.BlockSpec((TB, out_f), lambda i: (i, 0))

    flops = 2 * Bp * (in_f * H1p + H1p * H2p + H2p * out_f)
    bytes_accessed = (
        x_p.size * 4
        + (w1_p.size + w2_p.size + w3_p.size + b1_p.size + b2_p.size + b3_p.size) * 4
        + Bp * out_f * 4
    )

    y = pl.pallas_call(
        mlp_kernel,
        out_shape=jax.ShapeDtypeStruct((Bp, out_f), f32),
        grid=grid,
        in_specs=in_specs,
        out_specs=out_specs,
        compiler_params=pltpu.CompilerParams(
            dimension_semantics=("parallel",),
        ),
        cost_estimate=pl.CostEstimate(
            flops=flops, transcendentals=0, bytes_accessed=bytes_accessed
        ),
    )(x_p, w1_p, b1_p, w2_p, b2_p, w3_p, b3_p)

    if Bp != B:
        y = y[:B]
    return y.astype(x.dtype)


def init_params(key, in_features=6, h1=8, h2=9, out_features=2):
    """Deterministic init mimicking nn.Linear's U(-1/sqrt(fan_in), 1/sqrt(fan_in))."""
    ks = jax.random.split(key, 6)

    def lin(kw, kb, fan_in, fan_out):
        bound = 1.0 / jnp.sqrt(fan_in)
        w = jax.random.uniform(kw, (fan_in, fan_out), jnp.float32, -bound, bound)
        b = jax.random.uniform(kb, (1, fan_out), jnp.float32, -bound, bound)
        return w, b

    w1, b1 = lin(ks[0], ks[1], in_features, h1)
    w2, b2 = lin(ks[2], ks[3], h1, h2)
    w3, b3 = lin(ks[4], ks[5], h2, out_features)
    return {"w1": w1, "b1": b1, "w2": w2, "b2": b2, "w3": w3, "b3": b3}


def mlp_reference_f32(x, p):
    h1 = jnp.maximum(x @ p["w1"] + p["b1"], 0.0)
    h2 = jnp.maximum(h1 @ p["w2"] + p["b2"], 0.0)
    return h2 @ p["w3"] + p["b3"]


if __name__ == "__main__":
    key = jax.random.PRNGKey(0)
    kx, kx2, kp = jax.random.split(key, 3)

    in_features, h1, h2, out_features = 6, 8, 9, 2
    params = init_params(kp, in_features=in_features, h1=h1, h2=h2,
                         out_features=out_features)

    # Primary small-shape run (batch=8, in_features=6).
    batch = 8
    x = jax.random.normal(kx, (batch, in_features), jnp.float32)
    out = jax.block_until_ready(mlp_forward(x, params))
    assert out.shape == (batch, out_features), out.shape
    ref = mlp_reference_f32(x, params)
    assert jnp.allclose(out, ref, atol=2e-2, rtol=2e-2), "mismatch vs f32 reference"

    # Awkward batch: exercises the batch pad + partial last grid block path.
    batch2 = 20
    x2 = jax.random.normal(kx2, (batch2, in_features), jnp.float32)
    out2 = jax.block_until_ready(mlp_forward(x2, params))
    assert out2.shape == (batch2, out_features), out2.shape
    ref2 = mlp_reference_f32(x2, params)
    assert jnp.allclose(out2, ref2, atol=2e-2, rtol=2e-2), "mismatch vs f32 reference (B=20)"

    print("KERNEL_OK")
</pallas_src>

<mosaic_0001>
module attributes {stable_mosaic.version = 11 : i64} {
  func.func @mlp_kernel(%arg0: i32, %arg1: memref<8x6xf32, #tpu.memory_space<vmem>>, %arg2: memref<6x128xf32, #tpu.memory_space<vmem>>, %arg3: memref<1x128xf32, #tpu.memory_space<vmem>>, %arg4: memref<128x128xf32, #tpu.memory_space<vmem>>, %arg5: memref<1x128xf32, #tpu.memory_space<vmem>>, %arg6: memref<128x2xf32, #tpu.memory_space<vmem>>, %arg7: memref<1x2xf32, #tpu.memory_space<vmem>>, %arg8: memref<8x2xf32, #tpu.memory_space<vmem>>) attributes {dimension_semantics = [#tpu.dimension_semantics<parallel>], iteration_bounds = array<i64: 1>, scalar_prefetch = 0 : i64, scratch_operands = 0 : i64, tpu.core_type = #tpu.core_type<tc>, window_params = [{transform_indices = @transform_0, window_bounds = array<i64: 8, 6>}, {pipeline_mode = #tpu.pipeline_mode<synchronous>, transform_indices = @transform_1, window_bounds = array<i64: 6, 128>}, {pipeline_mode = #tpu.pipeline_mode<synchronous>, transform_indices = @transform_2, window_bounds = array<i64: 1, 128>}, {pipeline_mode = #tpu.pipeline_mode<synchronous>, transform_indices = @transform_3, window_bounds = array<i64: 128, 128>}, {pipeline_mode = #tpu.pipeline_mode<synchronous>, transform_indices = @transform_4, window_bounds = array<i64: 1, 128>}, {pipeline_mode = #tpu.pipeline_mode<synchronous>, transform_indices = @transform_5, window_bounds = array<i64: 128, 2>}, {pipeline_mode = #tpu.pipeline_mode<synchronous>, transform_indices = @transform_6, window_bounds = array<i64: 1, 2>}, {transform_indices = @transform_7, window_bounds = array<i64: 8, 2>}]} {
    %c0 = arith.constant 0 : index
    %c0_0 = arith.constant 0 : index
    %0 = vector.load %arg1[%c0, %c0_0] : memref<8x6xf32, #tpu.memory_space<vmem>>, vector<8x6xf32>
    %c0_1 = arith.constant 0 : index
    %c0_2 = arith.constant 0 : index
    %1 = vector.load %arg2[%c0_1, %c0_2] : memref<6x128xf32, #tpu.memory_space<vmem>>, vector<6x128xf32>
    %cst = arith.constant dense<0.000000e+00> : vector<8x128xf32>
    %2 = tpu.matmul %0, %1, %cst {dimension_numbers = #tpu.dot_dimension_numbers<[1], [0], [0], [1], [0, 0, 1, 1], [], []>} : vector<8x6xf32>, vector<6x128xf32>, vector<8x128xf32> -> vector<8x128xf32>
    %c0_3 = arith.constant 0 : index
    %c0_4 = arith.constant 0 : index
    %3 = vector.load %arg3[%c0_3, %c0_4] : memref<1x128xf32, #tpu.memory_space<vmem>>, vector<1x128xf32>
    %4 = vector.broadcast %3 : vector<1x128xf32> to vector<8x128xf32>
    %5 = arith.addf %2, %4 : vector<8x128xf32>
    %cst_5 = arith.constant 0.000000e+00 : f32
    %6 = vector.broadcast %cst_5 : f32 to vector<8x128xf32>
    %7 = arith.maximumf %5, %6 : vector<8x128xf32>
    %c0_6 = arith.constant 0 : index
    %c0_7 = arith.constant 0 : index
    %8 = vector.load %arg4[%c0_6, %c0_7] : memref<128x128xf32, #tpu.memory_space<vmem>>, vector<128x128xf32>
    %cst_8 = arith.constant dense<0.000000e+00> : vector<8x128xf32>
    %9 = tpu.matmul %7, %8, %cst_8 {dimension_numbers = #tpu.dot_dimension_numbers<[1], [0], [0], [1], [0, 0, 1, 1], [], []>} : vector<8x128xf32>, vector<128x128xf32>, vector<8x128xf32> -> vector<8x128xf32>
    %c0_9 = arith.constant 0 : index
    %c0_10 = arith.constant 0 : index
    %10 = vector.load %arg5[%c0_9, %c0_10] : memref<1x128xf32, #tpu.memory_space<vmem>>, vector<1x128xf32>
    %11 = vector.broadcast %10 : vector<1x128xf32> to vector<8x128xf32>
    %12 = arith.addf %9, %11 : vector<8x128xf32>
    %cst_11 = arith.constant 0.000000e+00 : f32
    %13 = vector.broadcast %cst_11 : f32 to vector<8x128xf32>
    %14 = arith.maximumf %12, %13 : vector<8x128xf32>
    %c0_12 = arith.constant 0 : index
    %c0_13 = arith.constant 0 : index
    %15 = vector.load %arg6[%c0_12, %c0_13] : memref<128x2xf32, #tpu.memory_space<vmem>>, vector<128x2xf32>
    %cst_14 = arith.constant dense<0.000000e+00> : vector<8x2xf32>
    %16 = tpu.matmul %14, %15, %cst_14 {dimension_numbers = #tpu.dot_dimension_numbers<[1], [0], [0], [1], [0, 0, 1, 1], [], []>} : vector<8x128xf32>, vector<128x2xf32>, vector<8x2xf32> -> vector<8x2xf32>
    %c0_15 = arith.constant 0 : index
    %c0_16 = arith.constant 0 : index
    %17 = vector.load %arg7[%c0_15, %c0_16] : memref<1x2xf32, #tpu.memory_space<vmem>>, vector<1x2xf32>
    %18 = vector.broadcast %17 : vector<1x2xf32> to vector<8x2xf32>
    %19 = arith.addf %16, %18 : vector<8x2xf32>
    %c0_17 = arith.constant 0 : index
    %c0_18 = arith.constant 0 : index
    %20 = vector.load %arg8[%c0_17, %c0_18] : memref<8x2xf32, #tpu.memory_space<vmem>>, vector<8x2xf32>
    tpu.vector_store %arg8[%c0_17, %c0_18], %19 {strides = array<i32>} : memref<8x2xf32, #tpu.memory_space<vmem>>, vector<8x2xf32>,
    return
  }
  func.func @transform_0(%arg0: i32) -> (i32, i32) {
    %c0_i32 = arith.constant 0 : i32
    %c0_i32_0 = arith.constant 0 : i32
    return %arg0, %c0_i32 : i32, i32
  }
  func.func @transform_1(%arg0: i32) -> (i32, i32) {
    %c0_i32 = arith.constant 0 : i32
    %c0_i32_0 = arith.constant 0 : i32
    %c0_i32_1 = arith.constant 0 : i32
    return %c0_i32, %c0_i32_0 : i32, i32
  }
  func.func @transform_2(%arg0: i32) -> (i32, i32) {
    %c0_i32 = arith.constant 0 : i32
    %c0_i32_0 = arith.constant 0 : i32
    %c0_i32_1 = arith.constant 0 : i32
    return %c0_i32, %c0_i32_0 : i32, i32
  }
  func.func @transform_3(%arg0: i32) -> (i32, i32) {
    %c0_i32 = arith.constant 0 : i32
    %c0_i32_0 = arith.constant 0 : i32
    %c0_i32_1 = arith.constant 0 : i32
    return %c0_i32, %c0_i32_0 : i32, i32
  }
  func.func @transform_4(%arg0: i32) -> (i32, i32) {
    %c0_i32 = arith.constant 0 : i32
    %c0_i32_0 = arith.constant 0 : i32
    %c0_i32_1 = arith.constant 0 : i32
    return %c0_i32, %c0_i32_0 : i32, i32
  }
  func.func @transform_5(%arg0: i32) -> (i32, i32) {
    %c0_i32 = arith.constant 0 : i32
    %c0_i32_0 = arith.constant 0 : i32
    %c0_i32_1 = arith.constant 0 : i32
    return %c0_i32, %c0_i32_0 : i32, i32
  }
  func.func @transform_6(%arg0: i32) -> (i32, i32) {
    %c0_i32 = arith.constant 0 : i32
    %c0_i32_0 = arith.constant 0 : i32
    %c0_i32_1 = arith.constant 0 : i32
    return %c0_i32, %c0_i32_0 : i32, i32
  }
  func.func @transform_7(%arg0: i32) -> (i32, i32) {
    %c0_i32 = arith.constant 0 : i32
    %c0_i32_0 = arith.constant 0 : i32
    return %arg0, %c0_i32 : i32, i32
  }
}

</mosaic_0001>

<bundles_post_ra>
// kernel: mlp_forward.1
= control target key start
LH: loop header
LB: loop body
LE: loop exit
PB: predicated region body
PF: predicated region fallthrough
CT: control target
= control target key end

     0   :  { %vm36_vm0 = vcmask 1045504   ;;  %vm32_vm1 = vcmask 48128   ;;  %vm142_vm2 = vcmask 15360   ;;  %s307_s1 = inlined_call_operand.vmem [shape: f32[6,128], index: 1, kind: input, shape index: {}]   ;;  %s308_s0 = inlined_call_operand.vmem [shape: f32[8,6], index: 0, kind: input, shape index: {}]   ;;  %s309_s3 = inlined_call_operand.vmem [shape: f32[128,128], index: 3, kind: input, shape index: {}]   ;;  %s310_s2 = inlined_call_operand.vmem [shape: f32[1,128], index: 2, kind: input, shape index: {}]   ;;  %s311_s4 = inlined_call_operand.vmem [shape: f32[1,128], index: 4, kind: input, shape index: {}]   ;;  %s312_s5 = inlined_call_operand.vmem [shape: f32[128,2], index: 5, kind: input, shape index: {}]   ;;  %s313_s6 = inlined_call_operand.vmem [shape: f32[1,2], index: 6, kind: input, shape index: {}]   ;;  %s314_s7 = inlined_call_operand.vmem [shape: f32[8,2], index: 7, kind: output, shape index: {}]  }
   0x1   :  { %v27_v0 = vld [vmem:[%s307_s1] sm:$0x3f]  ;;  %v76_v2 = vld [vmem:[%s309_s3 + $0x78] sm:$0xff]  ;;  %v75_v3 = vld [vmem:[%s309_s3 + $0x70] sm:$0xff] }
   0x2   :  { %v26_v1 = vld [vmem:[%s308_s0] sm:$0xff]  ;;  %148 = vmatpush.msk.msra.mxu0 %vm36_vm0, %v27_v0  ;;  %81 = vmatpush.msra.mxu1 %v76_v2  ;;  %v74_v4 = vld [vmem:[%s309_s3 + $0x68] sm:$0xff]  ;;  %v72_v6 = vld [vmem:[%s309_s3 + $0x58] sm:$0xff] }
   0x3   :  { %149 = vmatmul.msk.f32.vlgmr.msra.gmra.mxu0 %vm32_vm1, %v26_v1  ;;  %v73_v5 = vld [vmem:[%s309_s3 + $0x60] sm:$0xff]  ;;  %v71_v7 = vld [vmem:[%s309_s3 + $0x50] sm:$0xff]  ;;  %v70_v8 = vld [vmem:[%s309_s3 + $0x48] sm:$0xff] }
   0x4   :  { %82 = vmatpush.msra.mxu1 %v75_v3  ;;  %v69_v9 = vld [vmem:[%s309_s3 + $0x40] sm:$0xff]  ;;  %v68_v10 = vld [vmem:[%s309_s3 + $0x38] sm:$0xff]  ;;  %v67_v11 = vld [vmem:[%s309_s3 + $0x30] sm:$0xff] }
   0x5   :  { %v66_v12 = vld [vmem:[%s309_s3 + $0x28] sm:$0xff]  ;;  %v65_v13 = vld [vmem:[%s309_s3 + $0x20] sm:$0xff]  ;;  %v64_v14 = vld [vmem:[%s309_s3 + $0x18] sm:$0xff] }
   0x6   :  { %83 = vmatpush.msra.mxu1 %v74_v4  ;;  %v63_v15 = vld [vmem:[%s309_s3 + $0x10] sm:$0xff]  ;;  %v62_v16 = vld [vmem:[%s309_s3 + $0x8] sm:$0xff]  ;;  %v61_v17 = vld [vmem:[%s309_s3] sm:$0xff] }
   0x7   :  { %v117_v18 = vld [vmem:[%s312_s5 + $0x78] sm:$0xff]  ;;  %v116_v19 = vld [vmem:[%s312_s5 + $0x70] sm:$0xff]  ;;  %v115_v20 = vld [vmem:[%s312_s5 + $0x68] sm:$0xff] }
   0x8   :  { %84 = vmatpush.msra.mxu1 %v73_v5  ;;  %122 = vmatpush.msra.mxu2 %v117_v18  ;;  %v114_v21 = vld [vmem:[%s312_s5 + $0x60] sm:$0xff]  ;;  %v113_v22 = vld [vmem:[%s312_s5 + $0x58] sm:$0xff]  ;;  %v112_v23 = vld [vmem:[%s312_s5 + $0x50] sm:$0xff] }
   0x9   :  { %v111_v24 = vld [vmem:[%s312_s5 + $0x48] sm:$0xff]  ;;  %v110_v25 = vld [vmem:[%s312_s5 + $0x40] sm:$0xff]  ;;  %v109_v26 = vld [vmem:[%s312_s5 + $0x38] sm:$0xff] }
   0xa   :  { %85 = vmatpush.msra.mxu1 %v72_v6  ;;  %123 = vmatpush.msra.mxu2 %v116_v19  ;;  %v108_v27 = vld [vmem:[%s312_s5 + $0x30] sm:$0xff]  ;;  %v107_v28 = vld [vmem:[%s312_s5 + $0x28] sm:$0xff]  ;;  %v106_v29 = vld [vmem:[%s312_s5 + $0x20] sm:$0xff] }
   0xb   :  { %v105_v30 = vld [vmem:[%s312_s5 + $0x18] sm:$0xff]  ;;  %v150_v31 = vld [vmem:[%s310_s2] ss:$0 sm:$0xff]  ;;  %v104_v35 = vld [vmem:[%s312_s5 + $0x10] sm:$0xff] }
   0xc   :  { %86 = vmatpush.msra.mxu1 %v71_v7  ;;  %124 = vmatpush.msra.mxu2 %v115_v20  ;;  %v103_v36 = vld [vmem:[%s312_s5 + $0x8] sm:$0xff]  ;;  %v102_v37 = vld [vmem:[%s312_s5] sm:$0xff] }
   0xd   :  { %v151_v38 = vld [vmem:[%s311_s4] ss:$0 sm:$0xff] }
   0xe   :  { %87 = vmatpush.msra.mxu1 %v70_v8  ;;  %125 = vmatpush.msra.mxu2 %v114_v21  ;;  %v152_v42 = vld [vmem:[%s313_s6] ss:$0 sm:$0xff] }
  0x10   :  { %88 = vmatpush.msra.mxu1 %v69_v9  ;;  %126 = vmatpush.msra.mxu2 %v113_v22 }
  0x12   :  { %89 = vmatpush.msra.mxu1 %v68_v10  ;;  %127 = vmatpush.msra.mxu2 %v112_v23 }
  0x14   :  { %90 = vmatpush.msra.mxu1 %v67_v11  ;;  %128 = vmatpush.msra.mxu2 %v111_v24 }
  0x16   :  { %91 = vmatpush.msra.mxu1 %v66_v12  ;;  %129 = vmatpush.msra.mxu2 %v110_v25 }
  0x18   :  { %92 = vmatpush.msra.mxu1 %v65_v13  ;;  %130 = vmatpush.msra.mxu2 %v109_v26 }
  0x1a   :  { %93 = vmatpush.msra.mxu1 %v64_v14  ;;  %131 = vmatpush.msra.mxu2 %v108_v27 }
  0x1c   :  { %94 = vmatpush.msra.mxu1 %v63_v15  ;;  %132 = vmatpush.msra.mxu2 %v107_v28 }
  0x1e   :  { %95 = vmatpush.msra.mxu1 %v62_v16  ;;  %133 = vmatpush.msra.mxu2 %v106_v29 }
  0x20   :  { %96 = vmatpush.msra.mxu1 %v61_v17  ;;  %134 = vmatpush.msra.mxu2 %v105_v30 }
  0x22   :  { %135 = vmatpush.msra.mxu2 %v104_v35 }
  0x24   :  { %136 = vmatpush.msra.mxu2 %v103_v36 }
  0x26   :  { %137 = vmatpush.msra.mxu2 %v102_v37 }
  0x80   :  { %v57_v32 = vpop.f32.mrf.mxu0 }
  0x81   :  { %v58_v33 = vadd.f32 %v150_v31, %v57_v32 }
  0x83   :  { %v60_v34 = vmax.f32 %v58_v33, 0.0 }
  0x85   :  { %97 = vmatmul.f32.vlgmr.msra.gmra.mxu1 %v60_v34 }
 0x102   :  { %v98_v39 = vpop.f32.mrf.mxu1 }
 0x103   :  { %v99_v40 = vadd.f32 %v151_v38, %v98_v39 }
 0x105   :  { %v101_v41 = vmax.f32 %v99_v40, 0.0 }
 0x107   :  { %138 = vmatmul.f32.vlgmr.msra.gmra.mxu2 %v101_v41 }
 0x18a   :  { %v139_v43 = vpop.f32.mrf.mxu2 }
 0x18b   :  { %v140_v44 = vadd.f32 %v152_v42, %v139_v43 }
 0x18d   :  { %143 = vst.msk [vmem:[%s314_s7] sm:$0xff] %vm142_vm2, %v140_v44 }

</bundles_post_ra>
